<compile_context>
chip_gen: v7x
topology: tpu7x:2x2x1
jax: 0.10.0
libtpu: 0.0.40
codegen_flags: <defaults>
</compile_context>

<pallas_src>
import jax
import jax.numpy as jnp
from jax.experimental import pallas as pl
from jax.experimental.pallas import tpu as pltpu


def _vmem_capacity_bytes(default=64 * 1024 * 1024):
    """Physical VMEM per TensorCore; conservative 64 MiB (v7x) fallback."""
    try:
        info = pltpu.get_tpu_info()
        cap = int(getattr(info, "vmem_capacity_bytes", 0))
        if cap > 0:
            return cap
    except Exception:
        pass
    return default


def _pick_tff(d_ff, target):
    """Largest multiple-of-128 divisor of d_ff that is <= target (else whole d_ff)."""
    if d_ff <= target:
        return d_ff
    if d_ff % 128 != 0:
        # TODO(synk): a d_ff with no 128-multiple divisor falls back to a single
        # whole-d_ff chunk; pad d_ff / mask in-kernel if that ever OOMs VMEM.
        return d_ff
    top = max(128, (min(target, d_ff) // 128) * 128)
    for cand in range(top, 127, -128):
        if d_ff % cand == 0:
            return cand
    return d_ff


# ---------------------------------------------------------------------------
# Kernels
# ---------------------------------------------------------------------------

def ffn_resident_kernel(x_ref, w1_ref, b1_ref, w2_ref, b2_ref, o_ref):
    """Whole-weight-resident path: grid = (M_tiles,); W1/W2 DMA'd once per call."""
    h = jnp.dot(x_ref[...], w1_ref[...], preferred_element_type=jnp.float32)
    h = jnp.maximum(h + b1_ref[...], 0.0)
    # TODO(synk): training-mode dropout would mask `h` here via
    # pltpu.prng_seed + pltpu.prng_random_bits; eval mode == identity.
    out = jnp.dot(h.astype(w2_ref.dtype), w2_ref[...],
                  preferred_element_type=jnp.float32)
    o_ref[...] = (out + b2_ref[...]).astype(o_ref.dtype)


def ffn_chunked_kernel(x_ref, w1_ref, b1_ref, w2_ref, b2_ref, o_ref, acc_ref):
    """Chunked-d_ff path: grid = (M_tiles, F_tiles); reduction over d_ff chunks."""
    f = pl.program_id(1)

    @pl.when(f == 0)
    def _():
        acc_ref[...] = jnp.zeros_like(acc_ref)

    # h_c = relu(x @ W1[:, chunk] + b1[chunk])   (tm, tff) in f32
    h = jnp.dot(x_ref[...], w1_ref[...], preferred_element_type=jnp.float32)
    h = jnp.maximum(h + b1_ref[...], 0.0)
    # TODO(synk): eval-mode dropout == identity (see resident kernel note).

    # acc += h_c @ W2[chunk, :]
    acc_ref[...] += jnp.dot(h.astype(w2_ref.dtype), w2_ref[...],
                            preferred_element_type=jnp.float32)

    @pl.when(f == pl.num_programs(1) - 1)
    def _():
        o_ref[...] = (acc_ref[...] + b2_ref[...]).astype(o_ref.dtype)


# ---------------------------------------------------------------------------
# Wrapper
# ---------------------------------------------------------------------------

def positionwise_ffn(x, w1, b1, w2, b2, *, tm=512, tff=None,
                     compute_dtype=None, weight_resident=None,
                     vmem_budget_bytes=None):
    """y = relu(x @ W1 + b1) @ W2 + b2   (dropout == identity at eval time).

    x: (batch, seq, d_model); w1: (d_model, d_ff); w2: (d_ff, d_model)
    (weights pre-transposed relative to PyTorch's (out, in) layout).

    compute_dtype: cast x/W1/W2 (e.g. jnp.bfloat16) for native MXU issue;
        accumulation stays f32 and the output keeps x's original dtype.
        This is the largest compute-side lever when parameters arrive as f32
        (standard bf16-matmul accuracy trade-off).
    weight_resident: None = auto (resident when W1+W2 fit the VMEM budget,
        typical on v5e/v6e; chunked on v7x), or force True/False.
    tm: row tile; keep a multiple of 256 on v6e/v7x (128 on v5e).
    """
    batch, seq, d_model = x.shape
    d_ff = w1.shape[1]
    M = batch * seq
    out_dtype = x.dtype

    if compute_dtype is not None:
        x = x.astype(compute_dtype)
        w1 = w1.astype(compute_dtype)
        w2 = w2.astype(compute_dtype)

    x2 = x.reshape(M, d_model)
    b1_2 = b1.astype(jnp.float32).reshape(1, d_ff)
    b2_2 = b2.astype(jnp.float32).reshape(1, d_model)

    # Row tile: multiple of 8 (default 512) or the full M; ragged M is handled
    # by pl.cdiv grid + masked edge-block writeback (no host pad/slice copies).
    tm_eff = tm if M >= tm else M
    grid_m = int(pl.cdiv(M, tm_eff))

    if vmem_budget_bytes is None:
        vmem_budget_bytes = int(_vmem_capacity_bytes() * 0.85)
    vmem_budget_bytes = int(vmem_budget_bytes)

    def nbytes(a):
        return int(a.size) * a.dtype.itemsize

    x_itemsize = x.dtype.itemsize
    o_itemsize = jnp.dtype(out_dtype).itemsize
    w_itemsize = w1.dtype.itemsize

    x_tile = tm_eff * d_model * x_itemsize
    o_tile = tm_eff * d_model * o_itemsize
    h_tile = tm_eff * d_ff * 4                       # f32 intermediate (resident path)
    w_total = nbytes(w1) + nbytes(w2)
    bias_total = nbytes(b1_2) + nbytes(b2_2)

    # Resident footprint: x/out double-buffered; weights counted x2 to stay
    # conservative about buffer allocation, plus the f32 intermediate.
    resident_need = 2 * (x_tile + o_tile + w_total + bias_total) + h_tile
    if weight_resident is None:
        weight_resident = resident_need <= vmem_budget_bytes

    if weight_resident:
        grid = (grid_m,)
        in_specs = [
            pl.BlockSpec((tm_eff, d_model), lambda i: (i, 0)),     # x rows
            pl.BlockSpec((d_model, d_ff), lambda i: (0, 0)),       # W1 (resident)
            pl.BlockSpec((1, d_ff), lambda i: (0, 0)),             # b1
            pl.BlockSpec((d_ff, d_model), lambda i: (0, 0)),       # W2 (resident)
            pl.BlockSpec((1, d_model), lambda i: (0, 0)),          # b2
        ]
        out_specs = pl.BlockSpec((tm_eff, d_model), lambda i: (i, 0))
        scratch_shapes = []
        kernel = ffn_resident_kernel
        dim_sem = ("parallel",)
        weight_streams = 1
    else:
        # Largest d_ff chunk (multiple of 128 dividing d_ff) that fits the
        # budget together with the double-buffered x/out tiles + accumulator.
        if tff is None:
            fixed = 2 * (x_tile + o_tile) + tm_eff * d_model * 4 + 2 * d_model * 4
            per_tff = 2 * (2 * d_model * w_itemsize + 4)           # W1 col + W2 row (+b1), x2 buffers
            tff = max(128, (vmem_budget_bytes - fixed) // max(per_tff, 1))
        tff_eff = _pick_tff(d_ff, int(tff))
        grid = (grid_m, d_ff // tff_eff)
        in_specs = [
            pl.BlockSpec((tm_eff, d_model), lambda i, f: (i, 0)),   # x rows
            pl.BlockSpec((d_model, tff_eff), lambda i, f: (0, f)),  # W1 chunk
            pl.BlockSpec((1, tff_eff), lambda i, f: (0, f)),        # b1 chunk
            pl.BlockSpec((tff_eff, d_model), lambda i, f: (f, 0)),  # W2 chunk
            pl.BlockSpec((1, d_model), lambda i, f: (0, 0)),        # b2
        ]
        out_specs = pl.BlockSpec((tm_eff, d_model), lambda i, f: (i, 0))
        scratch_shapes = [pltpu.VMEM((tm_eff, d_model), jnp.float32)]
        kernel = ffn_chunked_kernel
        # NOTE: on v7x, pltpu.CORE_PARALLEL on the M axis shards it across the
        # two TensorCores (each TC then streams the full weights).
        dim_sem = ("parallel", "arbitrary")
        weight_streams = grid_m

    cost = pl.CostEstimate(
        flops=int(4 * M * d_model * d_ff),            # two matmuls
        transcendentals=0,
        bytes_accessed=int(nbytes(x2) + M * d_model * o_itemsize
                           + weight_streams * (w_total + bias_total)),
    )

    out2 = pl.pallas_call(
        kernel,
        out_shape=jax.ShapeDtypeStruct((M, d_model), out_dtype),
        grid_spec=pltpu.PrefetchScalarGridSpec(
            num_scalar_prefetch=0,
            grid=grid,
            in_specs=in_specs,
            out_specs=out_specs,
            scratch_shapes=scratch_shapes,
        ),
        compiler_params=pltpu.CompilerParams(
            dimension_semantics=dim_sem,
            vmem_limit_bytes=vmem_budget_bytes,
        ),
        cost_estimate=cost,
    )(x2, w1, b1_2, w2, b2_2)

    return out2.reshape(batch, seq, d_model)


def _ref_ffn(x, w1, b1, w2, b2):
    h = jnp.maximum(x @ w1 + b1, 0.0)
    return h @ w2 + b2


if __name__ == "__main__":
    # Small shapes consistent with the module: batch=2, seq=8, d_model=32, d_ff=256.
    batch, seq, d_model, d_ff = 2, 8, 32, 256
    key = jax.random.PRNGKey(0)
    kx, k1, kb1, k2, kb2 = jax.random.split(key, 5)

    x = jax.random.normal(kx, (batch, seq, d_model), dtype=jnp.float32)

    # nn.Linear-style init (uniform +/- 1/sqrt(fan_in)), stored pre-transposed.
    lim1 = 1.0 / (d_model ** 0.5)
    lim2 = 1.0 / (d_ff ** 0.5)
    w1 = jax.random.uniform(k1, (d_model, d_ff), jnp.float32, -lim1, lim1)
    b1 = jax.random.uniform(kb1, (d_ff,), jnp.float32, -lim1, lim1)
    w2 = jax.random.uniform(k2, (d_ff, d_model), jnp.float32, -lim2, lim2)
    b2 = jax.random.uniform(kb2, (d_model,), jnp.float32, -lim2, lim2)

    ref = _ref_ffn(x, w1, b1, w2, b2)

    # 1) Auto path (tiny weights -> VMEM-resident W1/W2), f32 compute.
    out = jax.block_until_ready(positionwise_ffn(x, w1, b1, w2, b2))
    assert out.shape == (batch, seq, d_model)
    assert jnp.allclose(out, ref, atol=1e-4, rtol=1e-4)

    # 2) Forced chunked-d_ff reduction path (configuration used when W1+W2
    #    exceed the VMEM budget, e.g. v7x); 2 chunks of 128.
    out_c = jax.block_until_ready(
        positionwise_ffn(x, w1, b1, w2, b2, weight_resident=False, tff=128))
    assert jnp.allclose(out_c, ref, atol=1e-4, rtol=1e-4)

    # 3) bf16 MXU operands (f32 accumulation, f32 output) -- the production
    #    configuration when parameters arrive as f32.
    out_bf16 = jax.block_until_ready(
        positionwise_ffn(x, w1, b1, w2, b2, compute_dtype=jnp.bfloat16))
    assert jnp.allclose(out_bf16, ref, atol=1e-1, rtol=1e-1)

    print("KERNEL_OK")
</pallas_src>

<mosaic_0001>
module attributes {stable_mosaic.version = 11 : i64} {
  func.func @ffn_resident_kernel(%arg0: i32, %arg1: memref<16x32xf32, #tpu.memory_space<vmem>>, %arg2: memref<32x256xf32, #tpu.memory_space<vmem>>, %arg3: memref<1x256xf32, #tpu.memory_space<vmem>>, %arg4: memref<256x32xf32, #tpu.memory_space<vmem>>, %arg5: memref<1x32xf32, #tpu.memory_space<vmem>>, %arg6: memref<16x32xf32, #tpu.memory_space<vmem>>) attributes {dimension_semantics = [#tpu.dimension_semantics<parallel>], iteration_bounds = array<i64: 1>, scalar_prefetch = 0 : i64, scratch_operands = 0 : i64, tpu.core_type = #tpu.core_type<tc>, window_params = [{transform_indices = @transform_0, window_bounds = array<i64: 16, 32>}, {pipeline_mode = #tpu.pipeline_mode<synchronous>, transform_indices = @transform_1, window_bounds = array<i64: 32, 256>}, {pipeline_mode = #tpu.pipeline_mode<synchronous>, transform_indices = @transform_2, window_bounds = array<i64: 1, 256>}, {pipeline_mode = #tpu.pipeline_mode<synchronous>, transform_indices = @transform_3, window_bounds = array<i64: 256, 32>}, {pipeline_mode = #tpu.pipeline_mode<synchronous>, transform_indices = @transform_4, window_bounds = array<i64: 1, 32>}, {transform_indices = @transform_5, window_bounds = array<i64: 16, 32>}]} {
    %c0 = arith.constant 0 : index
    %c0_0 = arith.constant 0 : index
    %0 = vector.load %arg1[%c0, %c0_0] : memref<16x32xf32, #tpu.memory_space<vmem>>, vector<16x32xf32>
    %c0_1 = arith.constant 0 : index
    %c0_2 = arith.constant 0 : index
    %1 = vector.load %arg2[%c0_1, %c0_2] : memref<32x256xf32, #tpu.memory_space<vmem>>, vector<32x256xf32>
    %cst = arith.constant dense<0.000000e+00> : vector<16x256xf32>
    %2 = tpu.matmul %0, %1, %cst {dimension_numbers = #tpu.dot_dimension_numbers<[1], [0], [0], [1], [0, 0, 1, 1], [], []>} : vector<16x32xf32>, vector<32x256xf32>, vector<16x256xf32> -> vector<16x256xf32>
    %c0_3 = arith.constant 0 : index
    %c0_4 = arith.constant 0 : index
    %3 = vector.load %arg3[%c0_3, %c0_4] : memref<1x256xf32, #tpu.memory_space<vmem>>, vector<1x256xf32>
    %4 = vector.broadcast %3 : vector<1x256xf32> to vector<16x256xf32>
    %5 = arith.addf %2, %4 : vector<16x256xf32>
    %cst_5 = arith.constant 0.000000e+00 : f32
    %6 = vector.broadcast %cst_5 : f32 to vector<16x256xf32>
    %7 = arith.maximumf %5, %6 : vector<16x256xf32>
    %c0_6 = arith.constant 0 : index
    %c0_7 = arith.constant 0 : index
    %8 = vector.load %arg4[%c0_6, %c0_7] : memref<256x32xf32, #tpu.memory_space<vmem>>, vector<256x32xf32>
    %cst_8 = arith.constant dense<0.000000e+00> : vector<16x32xf32>
    %9 = tpu.matmul %7, %8, %cst_8 {dimension_numbers = #tpu.dot_dimension_numbers<[1], [0], [0], [1], [0, 0, 1, 1], [], []>} : vector<16x256xf32>, vector<256x32xf32>, vector<16x32xf32> -> vector<16x32xf32>
    %c0_9 = arith.constant 0 : index
    %c0_10 = arith.constant 0 : index
    %10 = vector.load %arg5[%c0_9, %c0_10] : memref<1x32xf32, #tpu.memory_space<vmem>>, vector<1x32xf32>
    %11 = vector.broadcast %10 : vector<1x32xf32> to vector<16x32xf32>
    %12 = arith.addf %9, %11 : vector<16x32xf32>
    %c0_11 = arith.constant 0 : index
    %c0_12 = arith.constant 0 : index
    %13 = vector.load %arg6[%c0_11, %c0_12] : memref<16x32xf32, #tpu.memory_space<vmem>>, vector<16x32xf32>
    tpu.vector_store %arg6[%c0_11, %c0_12], %12 {strides = array<i32>} : memref<16x32xf32, #tpu.memory_space<vmem>>, vector<16x32xf32>,
    return
  }
  func.func @transform_0(%arg0: i32) -> (i32, i32) {
    %c0_i32 = arith.constant 0 : i32
    %c0_i32_0 = arith.constant 0 : i32
    return %arg0, %c0_i32 : i32, i32
  }
  func.func @transform_1(%arg0: i32) -> (i32, i32) {
    %c0_i32 = arith.constant 0 : i32
    %c0_i32_0 = arith.constant 0 : i32
    %c0_i32_1 = arith.constant 0 : i32
    return %c0_i32, %c0_i32_0 : i32, i32
  }
  func.func @transform_2(%arg0: i32) -> (i32, i32) {
    %c0_i32 = arith.constant 0 : i32
    %c0_i32_0 = arith.constant 0 : i32
    %c0_i32_1 = arith.constant 0 : i32
    return %c0_i32, %c0_i32_0 : i32, i32
  }
  func.func @transform_3(%arg0: i32) -> (i32, i32) {
    %c0_i32 = arith.constant 0 : i32
    %c0_i32_0 = arith.constant 0 : i32
    %c0_i32_1 = arith.constant 0 : i32
    return %c0_i32, %c0_i32_0 : i32, i32
  }
  func.func @transform_4(%arg0: i32) -> (i32, i32) {
    %c0_i32 = arith.constant 0 : i32
    %c0_i32_0 = arith.constant 0 : i32
    %c0_i32_1 = arith.constant 0 : i32
    return %c0_i32, %c0_i32_0 : i32, i32
  }
  func.func @transform_5(%arg0: i32) -> (i32, i32) {
    %c0_i32 = arith.constant 0 : i32
    %c0_i32_0 = arith.constant 0 : i32
    return %arg0, %c0_i32 : i32, i32
  }
}

</mosaic_0001>

<bundles_post_ra>
// kernel: tpu_custom_call.1
= control target key start
LH: loop header
LB: loop body
LE: loop exit
PB: predicated region body
PF: predicated region fallthrough
CT: control target
= control target key end

     0   :  { %v372_v7 = vmov 0.0   ;;  %vm43_vm0 = vcmask 261120   ;;  %s554_s0 = inlined_call_operand.vmem [shape: f32[16,32], index: 0, kind: input, shape index: {}]   ;;  %s555_s1 = inlined_call_operand.vmem [shape: f32[32,256], index: 1, kind: input, shape index: {}]   ;;  %s556_s2 = inlined_call_operand.vmem [shape: f32[1,256], index: 2, kind: input, shape index: {}]   ;;  %s557_s3 = inlined_call_operand.vmem [shape: f32[256,32], index: 3, kind: input, shape index: {}]   ;;  %s558_s4 = inlined_call_operand.vmem [shape: f32[1,32], index: 4, kind: input, shape index: {}]   ;;  %s559_s5 = inlined_call_operand.hbm [shape: f32[16,32], index: 5, kind: output, shape index: {}]  }
   0x1   :  { %v24_v0 = vld [vmem:[%s555_s1 + $0x8] sm:$0xff]  ;;  %v26_v1 = vld [vmem:[%s555_s1 + $0x18] sm:$0xff]  ;;  %v23_v2 = vld [vmem:[%s555_s1] sm:$0xff]  ;;  %114 = vmatprep.mubr.f32.mxu0 %v372_v7 }
   0x2   :  { %v304_v3 = vpack.c.bf16 %v26_v1, %v24_v0  ;;  %v25_v4 = vld [vmem:[%s555_s1 + $0x10] sm:$0xff]  ;;  %v28_v5 = vld [vmem:[%s555_s1 + $0x28] sm:$0xff]  ;;  %v30_v6 = vld [vmem:[%s555_s1 + $0x38] sm:$0xff] }
   0x3   :  { %v306_v8 = vpack.c.bf16 %v25_v4, %v23_v2  ;;  %v308_v9 = vpack.c.bf16 %v30_v6, %v28_v5  ;;  %v27_v10 = vld [vmem:[%s555_s1 + $0x20] sm:$0xff]  ;;  %v29_v11 = vld [vmem:[%s555_s1 + $0x30] sm:$0xff]  ;;  %v148_v13 = vld [vmem:[%s557_s3 + $0x88] sm:$0xff] }
   0x4   :  { %305 = vmatprep.subr.bf16.mxu0 %v304_v3  ;;  %v147_v12 = vld [vmem:[%s557_s3 + $0x80] sm:$0xff]  ;;  %v310_v14 = vpack.c.bf16 %v29_v11, %v27_v10  ;;  %v132_v17 = vld [vmem:[%s557_s3 + $0x8] sm:$0xff]  ;;  %v149_v18 = vld [vmem:[%s557_s3 + $0x90] sm:$0xff] }
   0x5   :  { %307 = vmatpush1.bf16.msra.mxu0 %v306_v8  ;;  %v312_v15 = vpack.c.bf16 %v148_v13, %v147_v12  ;;  %v131_v16 = vld [vmem:[%s557_s3] sm:$0xff]  ;;  %v150_v20 = vld [vmem:[%s557_s3 + $0x98] sm:$0xff]  ;;  %v133_v21 = vld [vmem:[%s557_s3 + $0x10] sm:$0xff] }
   0x6   :  { %309 = vmatprep.subr.bf16.mxu0 %v308_v9  ;;  %v314_v19 = vpack.c.bf16 %v132_v17, %v131_v16  ;;  %v134_v22 = vld [vmem:[%s557_s3 + $0x18] sm:$0xff]  ;;  %v316_v23 = vpack.c.bf16 %v150_v20, %v149_v18  ;;  %v151_v24 = vld [vmem:[%s557_s3 + $0xa0] sm:$0xff]  ;;  %v152_v25 = vld [vmem:[%s557_s3 + $0xa8] sm:$0xff] }
   0x7   :  { %313 = vmatprep.subr.bf16.mxu1 %v312_v15  ;;  %v318_v26 = vpack.c.bf16 %v134_v22, %v133_v21  ;;  %v21_v27 = vld [vmem:[%s554_s0] sm:$0xff]  ;;  %v320_v28 = vpack.c.bf16 %v152_v25, %v151_v24  ;;  %v136_v30 = vld [vmem:[%s557_s3 + $0x28] sm:$0xff]  ;;  %v153_v31 = vld [vmem:[%s557_s3 + $0xb0] sm:$0xff] }
   0x8   :  { %315 = vmatpush3.bf16.msra.mxu1 %v314_v19  ;;  %v135_v29 = vld [vmem:[%s557_s3 + $0x20] sm:$0xff]  ;;  %v154_v32 = vld [vmem:[%s557_s3 + $0xb8] sm:$0xff]  ;;  %v22_v33 = vld [vmem:[%s554_s0 + $0x8] sm:$0xff] }
   0x9   :  { %311 = vmatpush1.bf16.msra.mxu0 %v310_v14  ;;  %317 = vmatprep.subr.bf16.mxu1 %v316_v23  ;;  %v322_v34 = vpack.c.bf16 %v136_v30, %v135_v29  ;;  %v324_v35 = vpack.c.bf16 %v154_v32, %v153_v31  ;;  %v137_v36 = vld [vmem:[%s557_s3 + $0x30] sm:$0xff]  ;;  %v138_v37 = vld [vmem:[%s557_s3 + $0x38] sm:$0xff] }
   0xc   :  { %263 = vmatmul.mubr.msk.f32.vlgmr.msra.gmra.mrb[0].mxu0 %vm43_vm0, %v21_v27  ;;  %319 = vmatpush3.bf16.msra.mxu1 %v318_v26 }
   0xd   :  { %120 = vmatprep.mubr.f32.mxu0 %v372_v7  ;;  %321 = vmatprep.subr.bf16.mxu1 %v320_v28 }
   0xe   :  { %10 = vsyncpa [#allocation3], 0  ;;  %v155_v38 = vld [vmem:[%s557_s3 + $0xc0] sm:$0xff]  ;;  %v156_v39 = vld [vmem:[%s557_s3 + $0xc8] sm:$0xff]  ;;  %v326_v40 = vpack.c.bf16 %v138_v37, %v137_v36  ;;  %v33_v63 = vlaneseq  ;;  %s373_s24 = smov [#allocation2]  }
   0xf   :  { %v328_v41 = vpack.c.bf16 %v156_v39, %v155_v38  ;;  %v139_v42 = vld [vmem:[%s557_s3 + $0x40] sm:$0xff]  ;;  %v140_v43 = vld [vmem:[%s557_s3 + $0x48] sm:$0xff]  ;;  %v157_v44 = vld [vmem:[%s557_s3 + $0xd0] sm:$0xff]  ;;  %s252_s25 = sshll.u32 %s373_s24, 4  ;;  %s253_s25 = int_to_ptr.vmem [resolvable:$true] %s252_s25 }
  0x10   :  { %264 = vmatmul.mubr.msk.f32.gmra.mrb[2].mxu0 %vm43_vm0, %v22_v33  ;;  %323 = vmatpush3.bf16.msra.mxu1 %v322_v34  ;;  %v158_v45 = vld [vmem:[%s557_s3 + $0xd8] sm:$0xff]  ;;  %v330_v46 = vpack.c.bf16 %v140_v43, %v139_v42  ;;  %v141_v48 = vld [vmem:[%s557_s3 + $0x50] sm:$0xff]  ;;  %v159_v50 = vld [vmem:[%s557_s3 + $0xe0] sm:$0xff]  ;;  %v34_v0 = vshrl.u32 %v33_v63, 7  ;;  %s348_s26 = scalar_lea.vmem %s253_s25, 256  ;;  %p353_p1 = scmp.lt.s32.totalorder %s253_s25, %s253_s25 }
  0x11   :  { %325 = vmatprep.subr.bf16.mxu1 %v324_v35  ;;  %v332_v47 = vpack.c.bf16 %v158_v45, %v157_v44  ;;  %v142_v49 = vld [vmem:[%s557_s3 + $0x58] sm:$0xff]  ;;  %v160_v51 = vld [vmem:[%s557_s3 + $0xe8] sm:$0xff]  ;;  %v143_v54 = vld [vmem:[%s557_s3 + $0x60] sm:$0xff]  ;;  %p349_p0 = scmp.ne.s32.totalorder %s253_s25, %s348_s26  ;;  %p354_p2 = scmp.lt.s32.totalorder %s348_s26, %s348_s26 }
  0x12   :  { %v334_v52 = vpack.c.bf16 %v142_v49, %v141_v48  ;;  %v336_v53 = vpack.c.bf16 %v160_v51, %v159_v50  ;;  %v144_v55 = vld [vmem:[%s557_s3 + $0x68] sm:$0xff]  ;;  %v161_v57 = vld [vmem:[%s557_s3 + $0xf0] sm:$0xff]  ;;  %v162_v58 = vld [vmem:[%s557_s3 + $0xf8] sm:$0xff]  ;;  %v35_v1 = vsub.s32 0, %v34_v0  ;;  %v39_v3 = vsub.s32 1, %v34_v0 }
  0x13   :  { %v338_v56 = vpack.c.bf16 %v144_v55, %v143_v54  ;;  %v340_v59 = vpack.c.bf16 %v162_v58, %v161_v57  ;;  %v145_v60 = vld [vmem:[%s557_s3 + $0x70] sm:$0xff]  ;;  %v146_v61 = vld [vmem:[%s557_s3 + $0x78] sm:$0xff]  ;;  %v31_v2 = vld [vmem:[%s556_s2] sm:$0x3]  ;;  %p355_p3 = por %p354_p2, %p353_p1 }
  0x14   :  { %327 = vmatpush3.bf16.msra.mxu1 %v326_v40  ;;  %v342_v62 = vpack.c.bf16 %v146_v61, %v145_v60  ;;  %v36_v4 = vrot.slane %v31_v2, %v35_v1  ;;  %v40_v5 = vrot.slane %v31_v2, %v39_v3  ;;  %v265_v19 = vld [vmem:[%s558_s4] ss:$0 sm:$0xff] }
  0x15   :  { %329 = vmatprep.subr.bf16.mxu1 %v328_v41  ;;  %p356_p4 = pnand %p355_p3, %p349_p0 }
  0x18   :  { %331 = vmatpush3.bf16.msra.mxu1 %v330_v46 }
  0x19   :  { %333 = vmatprep.subr.bf16.mxu1 %v332_v47 }
  0x1c   :  { %335 = vmatpush3.bf16.msra.mxu1 %v334_v52 }
  0x1d   :  { %337 = vmatprep.subr.bf16.mxu1 %v336_v53 }
  0x20   :  { %339 = vmatpush3.bf16.msra.mxu1 %v338_v56 }
  0x21   :  { %341 = vmatprep.subr.bf16.mxu1 %v340_v59 }
  0x24   :  { %343 = vmatpush3.bf16.msra.mxu1 %v342_v62 }
  0xdf   :  { %v116_v6 = vpop.f32.mrb[0].mxu0 }
  0xe0   :  { %v117_v7 = vadd.f32 %v116_v6, %v36_v4  ;;  %v118_v8 = vpop.f32.mrb[1].mxu0 }
  0xe1   :  { %v119_v9 = vadd.f32 %v118_v8, %v40_v5 }
  0xe2   :  { %v127_v12 = vmax.f32 %v117_v7, 0.0 }
  0xe3   :  { %v122_v10 = vpop.f32.mrb[2].mxu0  ;;  %v128_v11 = vmax.f32 %v119_v9, 0.0 }
  0xe4   :  { %v123_v13 = vadd.f32 %v122_v10, %v36_v4  ;;  %v124_v14 = vpop.f32.mrb[3].mxu0 }
  0xe5   :  { %v125_v15 = vadd.f32 %v124_v14, %v40_v5  ;;  %234 = vmatprep.mubr.f32.mxu1 %v128_v11 }
  0xe6   :  { %235 = vmatmul.mubr.f32.vlgmr.msra.gmra.mrb[0].mxu1 %v127_v12  ;;  %v129_v17 = vmax.f32 %v123_v13, 0.0 }
  0xe7   :  { %v130_v16 = vmax.f32 %v125_v15, 0.0 }
  0xe9   :  { %239 = vmatprep.mubr.f32.mxu1 %v130_v16 }
  0xea   :  { %240 = vmatmul.mubr.f32.gmra.mrb[2].mxu1 %v129_v17 }
 0x1b9   :  { %v298_v18 = vpop.f32.mrb[0].mxu1 }
 0x1ba   :  { %v299_v20 = vpop.f32.mrb[1].mxu1 }
 0x1bb   :  { %v300_v21 = vadd.f32 %v299_v20, %v298_v18 }
 0x1bd   :  { %v237_v22 = vadd.f32 %v300_v21, %v265_v19  ;;  %v301_v23 = vpop.f32.mrb[2].mxu1 }
 0x1be   :  { %v302_v24 = vpop.f32.mrb[3].mxu1 }
 0x1bf   :  { %245 = vst.msk [vmem:[#allocation2] sm:$0xff] %vm43_vm0, %v237_v22  ;;  %v303_v25 = vadd.f32 %v302_v24, %v301_v23 }
 0x1c1   :  { %v242_v26 = vadd.f32 %v303_v25, %v265_v19 }
 0x1c3   :  { %246 = vst.msk [vmem:[#allocation2 + $0x8] sm:$0xff] %vm43_vm0, %v242_v26 }
 0x1c4   :  { %359 = shalt.err (!%p356_p4)
}
 0x1c5   :  { %s360_s28 = scalar_lea.hbm %s559_s5, 256 }
 0x1c6   :  { %p361_p5 = scmp.ne.s32.totalorder %s559_s5, %s360_s28  ;;  %p364_p6 = scmp.lt.u32.totalorder %s360_s28, %s559_s5 }
 0x1c8   :  { %p366_p7 = pnand %p364_p6, %p361_p5 }
 0x1ca   :  { %369 = shalt.err (!%p366_p7)
}
 0x1cb   :  { %s374_s8 = smov 128   ;;  %s375_s9 = smov 8  }
 0x1cc   :  { %258 = dma.vmem_to_hbm [thread:$0]  %s253_s25, 256, %s559_s5, [#allocation3], %s374_s8, %s374_s8, %s375_s9  }
 0x1cd   :  { %370 = dma.done.wait [#allocation3], 256  }
 0x1ce   :  { %371 = vsyncadd [#allocation3], 4294967040 }
 0x1cf   :  { %262 = vsyncpa [#allocation3], 1 }

</bundles_post_ra>
